<compile_context>
chip_gen: v7x
topology: tpu7x:2x2x1
jax: 0.10.0
libtpu: 0.0.40
codegen_flags: <defaults>
</compile_context>

<pallas_src>
import jax
import jax.numpy as jnp
from jax import lax
from jax.experimental import pallas as pl
from jax.experimental.pallas import tpu as pltpu

_BN_EPS = 1e-5


def _round_up(x, m):
    return (x + m - 1) // m * m


# --------------------------------------------------------------------------
# fused Pallas kernel
# --------------------------------------------------------------------------

def _make_kernel(H, W, c1, c2p, has_ds, compute_dtype):
    """Fused BN->ReLU->conv3x3 (x3) + channel concat + residual, (C, H*W) layout."""
    HW = H * W
    offsets = [(dy, dx) for dy in (-1, 0, 1) for dx in (-1, 0, 1)]

    def body(x_ref, masks_ref, s1, b1, s2, b2, s3, b3, ds,
             w1_ref, w2_ref, w3_ref, o_ref):
        x = x_ref[0]                       # (cin, HW) f32 -- channels on sublanes
        masks = masks_ref[...]             # (9, HW) f32 border-validity masks

        def bn_relu(v, s_ref, b_ref):
            # folded (inference) batch-norm + ReLU; kept in f32 (v5e-safe VPU math)
            return jnp.maximum(v * s_ref[...] + b_ref[...], 0.0)

        def im2col(y):
            # (c, HW) -> (9c, HW).  +/-1 spatial shifts are XLU lane rotations of
            # the flat H*W axis; border taps are zeroed by precomputed masks.
            taps = []
            for k, (dy, dx) in enumerate(offsets):
                s = dy * W + dx
                if s == 0:
                    taps.append(y)
                else:
                    t = pltpu.roll(y, shift=(-s) % HW, axis=1)
                    taps.append(t * masks[k:k + 1, :])
            return jnp.concatenate(taps, axis=0)

        def conv_mm(col, w_ref):
            # one fat MXU contraction per conv: (Cout, 9c) x (9c, HW) -> (Cout, HW).
            # Weights were zero-padded along Cout in the wrapper, so each conv drops
            # its channels straight into its rows of the concatenated output.
            return lax.dot_general(
                w_ref[...], col.astype(compute_dtype),
                dimension_numbers=(((1,), (0,)), ((), ())),
                preferred_element_type=jnp.float32)

        y1 = bn_relu(x, s1, b1)
        d1 = conv_mm(im2col(y1), w1_ref)              # out1 -> rows [0, c1)

        y2 = bn_relu(d1[0:c1], s2, b2)
        d2 = conv_mm(im2col(y2), w2_ref)              # out2 -> rows [c1, c1+c2)

        # rows [c1+c2, c1+c2p) of d2 are exact zeros (zero weight rows), so this
        # c2p-row slice is a sublane-aligned view of conv3's (zero-padded) input.
        y3 = bn_relu(d2[c1:c1 + c2p], s3, b3)
        d3 = conv_mm(im2col(y3), w3_ref)              # out3 -> rows [c1+c2, Cout)

        if has_ds:
            s4, b4, wds_ref = ds                      # BN4 + ReLU + 1x1 conv
            y4 = bn_relu(x, s4, b4)
            res = lax.dot_general(
                wds_ref[...], y4.astype(compute_dtype),
                dimension_numbers=(((1,), (0,)), ((), ())),
                preferred_element_type=jnp.float32)
        else:
            res = x                                   # identity residual

        o_ref[0] = (res + d1 + d2 + d3).astype(o_ref.dtype)

    if has_ds:
        def kernel(x_ref, masks_ref, s1, b1, s2, b2, s3, b3, s4, b4,
                   w1_ref, w2_ref, w3_ref, wds_ref, o_ref):
            body(x_ref, masks_ref, s1, b1, s2, b2, s3, b3, (s4, b4, wds_ref),
                 w1_ref, w2_ref, w3_ref, o_ref)
    else:
        def kernel(x_ref, masks_ref, s1, b1, s2, b2, s3, b3,
                   w1_ref, w2_ref, w3_ref, o_ref):
            body(x_ref, masks_ref, s1, b1, s2, b2, s3, b3, None,
                 w1_ref, w2_ref, w3_ref, o_ref)
    return kernel


# --------------------------------------------------------------------------
# one-time parameter packing (amortized across forward calls -> "free" HBM work)
# --------------------------------------------------------------------------

def pack_params(params, H, W, compute_dtype=jnp.bfloat16):
    cin = params["in_planes"]
    cout = params["out_planes"]
    c1, c2 = cout // 2, cout // 4
    c2p = min(_round_up(c2, 8), cout - c1)      # conv3 input width used in-kernel
    has_ds = cin != cout
    cdt = compute_dtype

    def col(v, c=None):
        v = jnp.asarray(v, jnp.float32).reshape(-1, 1)
        if c is not None and v.shape[0] < c:
            v = jnp.pad(v, ((0, c - v.shape[0]), (0, 0)))   # padded rows stay 0
        return v

    def pack_conv_w(w_hwio, row_off, kin_pad=None):
        # (3,3,I,O) -> (cout, 9*Ipad): rows [row_off, row_off+O) filled (concat
        # folding), K ordered tap-major / input-channel-minor to match im2col.
        kh, kw, ci, co = w_hwio.shape
        w = jnp.transpose(w_hwio, (3, 0, 1, 2))              # (O, 3, 3, I)
        if kin_pad is not None and kin_pad > ci:
            w = jnp.pad(w, ((0, 0), (0, 0), (0, 0), (0, kin_pad - ci)))
            ci = kin_pad
        w = w.reshape(co, 9 * ci)
        full = jnp.zeros((cout, 9 * ci), jnp.float32)
        full = full.at[row_off:row_off + co].set(w)
        return full.astype(cdt)

    # border-validity masks for the 9 taps, over the flattened H*W lane axis
    hh = jnp.arange(H).reshape(H, 1)
    ww = jnp.arange(W).reshape(1, W)
    masks = []
    for dy in (-1, 0, 1):
        for dx in (-1, 0, 1):
            valid = ((hh + dy >= 0) & (hh + dy < H) &
                     (ww + dx >= 0) & (ww + dx < W))
            masks.append(valid.reshape(H * W))
    masks = jnp.stack(masks, axis=0).astype(jnp.float32)      # (9, HW)

    s1, b1 = params["bn1"]; s2, b2 = params["bn2"]
    s3, b3 = params["bn3"]; s4, b4 = params["bn4"]

    packed = dict(
        in_planes=cin, out_planes=cout, c1=c1, c2=c2, c2p=c2p,
        H=H, W=W, has_ds=has_ds, compute_dtype=cdt,
        masks=masks,
        s1=col(s1), b1=col(b1),
        s2=col(s2), b2=col(b2),
        s3=col(s3, c2p), b3=col(b3, c2p),
        w1=pack_conv_w(params["w1"], 0),
        w2=pack_conv_w(params["w2"], c1),
        w3=pack_conv_w(params["w3"], c1 + c2, kin_pad=c2p),
    )
    if has_ds:
        packed["s4"] = col(s4)
        packed["b4"] = col(b4)
        packed["wds"] = jnp.transpose(params["wds"]).astype(cdt)   # (cout, cin)
    return packed


# --------------------------------------------------------------------------
# forward wrapper: only free reshapes around the pallas_call
# --------------------------------------------------------------------------

def conv_block_forward(x_nchw, packed):
    cin, cout = packed["in_planes"], packed["out_planes"]
    c1, c2p = packed["c1"], packed["c2p"]
    H, W = packed["H"], packed["W"]
    has_ds = packed["has_ds"]
    HW = H * W

    N, C, Hx, Wx = x_nchw.shape
    assert C == cin and Hx == H and Wx == W

    # NCHW -> (N, C, H*W): contiguous reshape (free), NOT a transpose.
    x = x_nchw.reshape(N, C, HW).astype(jnp.float32)

    def cspec(arr):
        shape = tuple(arr.shape)
        nd = len(shape)
        return pl.BlockSpec(shape, lambda n: (0,) * nd)

    in_specs = [pl.BlockSpec((1, cin, HW), lambda n: (n, 0, 0)),
                cspec(packed["masks"]),
                cspec(packed["s1"]), cspec(packed["b1"]),
                cspec(packed["s2"]), cspec(packed["b2"]),
                cspec(packed["s3"]), cspec(packed["b3"])]
    args = [x, packed["masks"],
            packed["s1"], packed["b1"],
            packed["s2"], packed["b2"],
            packed["s3"], packed["b3"]]
    if has_ds:
        in_specs += [cspec(packed["s4"]), cspec(packed["b4"])]
        args += [packed["s4"], packed["b4"]]
    in_specs += [cspec(packed["w1"]), cspec(packed["w2"]), cspec(packed["w3"])]
    args += [packed["w1"], packed["w2"], packed["w3"]]
    if has_ds:
        in_specs += [cspec(packed["wds"])]
        args += [packed["wds"]]

    kernel = _make_kernel(H, W, c1, c2p, has_ds, packed["compute_dtype"])

    out = pl.pallas_call(
        kernel,
        out_shape=jax.ShapeDtypeStruct((N, cout, HW), jnp.float32),
        grid_spec=pltpu.PrefetchScalarGridSpec(
            num_scalar_prefetch=0,
            grid=(N,),
            in_specs=in_specs,
            out_specs=pl.BlockSpec((1, cout, HW), lambda n: (n, 0, 0)),
        ),
        compiler_params=pltpu.CompilerParams(
            dimension_semantics=("parallel",),
            # Tiny footprint here; raise (v5e/v6e: 128 MiB physical) for bigger
            # batch/H blocks, keep <= ~48 MiB when targeting v7x's 64 MiB VMEM.
            vmem_limit_bytes=32 * 1024 * 1024,
        ),
    )(*args)

    # (N, Cout, H*W) -> NCHW: another free contiguous reshape.
    return out.reshape(N, cout, H, W)


# --------------------------------------------------------------------------
# parameters
# --------------------------------------------------------------------------

def _fold_bn(gamma, beta, mean, var):
    scale = gamma / jnp.sqrt(var + _BN_EPS)
    bias = beta - mean * scale
    return scale, bias


def init_params(key, in_planes, out_planes):
    mid1, mid2 = out_planes // 2, out_planes // 4
    keys = jax.random.split(key, 20)
    k = iter(keys)

    def bn(c):
        gamma = 1.0 + 0.1 * jax.random.normal(next(k), (c,), jnp.float32)
        beta = 0.1 * jax.random.normal(next(k), (c,), jnp.float32)
        mean = 0.1 * jax.random.normal(next(k), (c,), jnp.float32)
        var = 1.0 + 0.1 * jax.random.uniform(next(k), (c,), jnp.float32)
        return _fold_bn(gamma, beta, mean, var)

    params = {}
    params["bn1"] = bn(in_planes)
    params["bn2"] = bn(mid1)
    params["bn3"] = bn(mid2)
    params["bn4"] = bn(in_planes)          # only used by the downsample branch
    # conv weights stored HWIO (contents are synthetic)
    params["w1"] = 0.1 * jax.random.normal(next(k), (3, 3, in_planes, mid1), jnp.float32)
    params["w2"] = 0.1 * jax.random.normal(next(k), (3, 3, mid1, mid2), jnp.float32)
    params["w3"] = 0.1 * jax.random.normal(next(k), (3, 3, mid2, mid2), jnp.float32)
    params["wds"] = 0.1 * jax.random.normal(next(k), (in_planes, out_planes), jnp.float32)
    params["in_planes"] = in_planes
    params["out_planes"] = out_planes
    return params


# --------------------------------------------------------------------------
# pure-JAX reference (same compute dtype for the dot/conv operands)
# --------------------------------------------------------------------------

def _ref_forward(x_nchw, params, compute_dtype=jnp.float32):
    cdt = compute_dtype
    x = jnp.transpose(x_nchw, (0, 2, 3, 1)).astype(jnp.float32)

    def bnr(y, sb):
        s, b = sb
        return jnp.maximum(y * s + b, 0.0)

    def conv(y, w):
        return lax.conv_general_dilated(
            y.astype(cdt), w.astype(cdt), window_strides=(1, 1), padding="SAME",
            dimension_numbers=("NHWC", "HWIO", "NHWC"),
            preferred_element_type=jnp.float32)

    out1 = conv(bnr(x, params["bn1"]), params["w1"])
    out2 = conv(bnr(out1, params["bn2"]), params["w2"])
    out3 = conv(bnr(out2, params["bn3"]), params["w3"])
    cat = jnp.concatenate([out1, out2, out3], axis=-1)
    if params["in_planes"] != params["out_planes"]:
        residual = lax.dot_general(
            bnr(x, params["bn4"]).astype(cdt), params["wds"].astype(cdt),
            dimension_numbers=(((3,), (0,)), ((), ())),
            preferred_element_type=jnp.float32)
    else:
        residual = x
    return jnp.transpose(cat + residual, (0, 3, 1, 2))


# --------------------------------------------------------------------------
# main
# --------------------------------------------------------------------------

if __name__ == "__main__":
    key = jax.random.PRNGKey(0)
    kx1, kp1, kx2, kp2 = jax.random.split(key, 4)
    N, H, W = 2, 16, 16

    # Case 1: in_planes != out_planes -> BN+ReLU+1x1-conv downsample residual.
    in_p, out_p = 8, 16
    x1 = jax.random.normal(kx1, (N, in_p, H, W), jnp.float32)    # PyTorch NCHW
    p1 = init_params(kp1, in_p, out_p)

    # 1a) exact f32 path, tight check against the f32 reference
    y1f = conv_block_forward(x1, pack_params(p1, H, W, compute_dtype=jnp.float32))
    jax.block_until_ready(y1f)
    r1f = _ref_forward(x1, p1, compute_dtype=jnp.float32)
    assert y1f.shape == (N, out_p, H, W), y1f.shape
    assert jnp.allclose(y1f, r1f, atol=1e-4, rtol=1e-4), \
        float(jnp.max(jnp.abs(y1f - r1f)))

    # 1b) bf16 MXU path, checked against a bf16-operand reference
    y1b = conv_block_forward(x1, pack_params(p1, H, W, compute_dtype=jnp.bfloat16))
    jax.block_until_ready(y1b)
    r1b = _ref_forward(x1, p1, compute_dtype=jnp.bfloat16)
    assert jnp.allclose(y1b, r1b, atol=1e-2, rtol=1e-2), \
        float(jnp.max(jnp.abs(y1b - r1b)))

    # Case 2: in_planes == out_planes -> identity residual (bf16 MXU path).
    in2 = out2_p = 16
    x2 = jax.random.normal(kx2, (N, in2, H, W), jnp.float32)
    p2 = init_params(kp2, in2, out2_p)
    y2 = conv_block_forward(x2, pack_params(p2, H, W, compute_dtype=jnp.bfloat16))
    jax.block_until_ready(y2)
    r2 = _ref_forward(x2, p2, compute_dtype=jnp.bfloat16)
    assert y2.shape == (N, out2_p, H, W), y2.shape
    assert jnp.allclose(y2, r2, atol=1e-2, rtol=1e-2), \
        float(jnp.max(jnp.abs(y2 - r2)))

    print("KERNEL_OK")
</pallas_src>

<mosaic_0001>
module attributes {stable_mosaic.version = 11 : i64} {
  func.func @kernel(%arg0: i32, %arg1: memref<1x8x256xf32, #tpu.memory_space<vmem>>, %arg2: memref<9x256xf32, #tpu.memory_space<vmem>>, %arg3: memref<8x1xf32, #tpu.memory_space<vmem>>, %arg4: memref<8x1xf32, #tpu.memory_space<vmem>>, %arg5: memref<8x1xf32, #tpu.memory_space<vmem>>, %arg6: memref<8x1xf32, #tpu.memory_space<vmem>>, %arg7: memref<8x1xf32, #tpu.memory_space<vmem>>, %arg8: memref<8x1xf32, #tpu.memory_space<vmem>>, %arg9: memref<8x1xf32, #tpu.memory_space<vmem>>, %arg10: memref<8x1xf32, #tpu.memory_space<vmem>>, %arg11: memref<16x72xf32, #tpu.memory_space<vmem>>, %arg12: memref<16x72xf32, #tpu.memory_space<vmem>>, %arg13: memref<16x72xf32, #tpu.memory_space<vmem>>, %arg14: memref<16x8xf32, #tpu.memory_space<vmem>>, %arg15: memref<1x16x256xf32, #tpu.memory_space<vmem>>) attributes {dimension_semantics = [#tpu.dimension_semantics<parallel>], iteration_bounds = array<i64: 2>, scalar_prefetch = 0 : i64, scratch_operands = 0 : i64, tpu.core_type = #tpu.core_type<tc>, window_params = [{transform_indices = @transform_0, window_bounds = array<i64: 1, 8, 256>}, {pipeline_mode = #tpu.pipeline_mode<synchronous>, transform_indices = @transform_1, window_bounds = array<i64: 9, 256>}, {pipeline_mode = #tpu.pipeline_mode<synchronous>, transform_indices = @transform_2, window_bounds = array<i64: 8, 1>}, {pipeline_mode = #tpu.pipeline_mode<synchronous>, transform_indices = @transform_3, window_bounds = array<i64: 8, 1>}, {pipeline_mode = #tpu.pipeline_mode<synchronous>, transform_indices = @transform_4, window_bounds = array<i64: 8, 1>}, {pipeline_mode = #tpu.pipeline_mode<synchronous>, transform_indices = @transform_5, window_bounds = array<i64: 8, 1>}, {pipeline_mode = #tpu.pipeline_mode<synchronous>, transform_indices = @transform_6, window_bounds = array<i64: 8, 1>}, {pipeline_mode = #tpu.pipeline_mode<synchronous>, transform_indices = @transform_7, window_bounds = array<i64: 8, 1>}, {pipeline_mode = #tpu.pipeline_mode<synchronous>, transform_indices = @transform_8, window_bounds = array<i64: 8, 1>}, {pipeline_mode = #tpu.pipeline_mode<synchronous>, transform_indices = @transform_9, window_bounds = array<i64: 8, 1>}, {pipeline_mode = #tpu.pipeline_mode<synchronous>, transform_indices = @transform_10, window_bounds = array<i64: 16, 72>}, {pipeline_mode = #tpu.pipeline_mode<synchronous>, transform_indices = @transform_11, window_bounds = array<i64: 16, 72>}, {pipeline_mode = #tpu.pipeline_mode<synchronous>, transform_indices = @transform_12, window_bounds = array<i64: 16, 72>}, {pipeline_mode = #tpu.pipeline_mode<synchronous>, transform_indices = @transform_13, window_bounds = array<i64: 16, 8>}, {transform_indices = @transform_14, window_bounds = array<i64: 1, 16, 256>}]} {
    %c0 = arith.constant 0 : index
    %c0_0 = arith.constant 0 : index
    %c0_1 = arith.constant 0 : index
    %0 = vector.load %arg1[%c0, %c0_0, %c0_1] : memref<1x8x256xf32, #tpu.memory_space<vmem>>, vector<1x8x256xf32>
    %1 = vector.shape_cast %0 : vector<1x8x256xf32> to vector<8x256xf32>
    %c0_2 = arith.constant 0 : index
    %c0_3 = arith.constant 0 : index
    %2 = vector.load %arg2[%c0_2, %c0_3] : memref<9x256xf32, #tpu.memory_space<vmem>>, vector<9x256xf32>
    %c0_4 = arith.constant 0 : index
    %c0_5 = arith.constant 0 : index
    %3 = vector.load %arg3[%c0_4, %c0_5] : memref<8x1xf32, #tpu.memory_space<vmem>>, vector<8x1xf32>
    %4 = vector.broadcast %3 : vector<8x1xf32> to vector<8x256xf32>
    %5 = arith.mulf %1, %4 : vector<8x256xf32>
    %c0_6 = arith.constant 0 : index
    %c0_7 = arith.constant 0 : index
    %6 = vector.load %arg4[%c0_6, %c0_7] : memref<8x1xf32, #tpu.memory_space<vmem>>, vector<8x1xf32>
    %7 = vector.broadcast %6 : vector<8x1xf32> to vector<8x256xf32>
    %8 = arith.addf %5, %7 : vector<8x256xf32>
    %cst = arith.constant 0.000000e+00 : f32
    %9 = vector.broadcast %cst : f32 to vector<8x256xf32>
    %10 = arith.maximumf %8, %9 : vector<8x256xf32>
    %c17_i32 = arith.constant 17 : i32
    %11 = tpu.dynamic_rotate %10 by %c17_i32 dim 1 : vector<8x256xf32>, i32 -> vector<8x256xf32>
    %12 = vector.extract_strided_slice %2 {offsets = [0, 0], sizes = [1, 256], strides = [1, 1]} : vector<9x256xf32> to vector<1x256xf32>
    %13 = vector.broadcast %12 : vector<1x256xf32> to vector<8x256xf32>
    %14 = arith.mulf %11, %13 : vector<8x256xf32>
    %c16_i32 = arith.constant 16 : i32
    %15 = tpu.dynamic_rotate %10 by %c16_i32 dim 1 : vector<8x256xf32>, i32 -> vector<8x256xf32>
    %16 = vector.extract_strided_slice %2 {offsets = [1, 0], sizes = [1, 256], strides = [1, 1]} : vector<9x256xf32> to vector<1x256xf32>
    %17 = vector.broadcast %16 : vector<1x256xf32> to vector<8x256xf32>
    %18 = arith.mulf %15, %17 : vector<8x256xf32>
    %c15_i32 = arith.constant 15 : i32
    %19 = tpu.dynamic_rotate %10 by %c15_i32 dim 1 : vector<8x256xf32>, i32 -> vector<8x256xf32>
    %20 = vector.extract_strided_slice %2 {offsets = [2, 0], sizes = [1, 256], strides = [1, 1]} : vector<9x256xf32> to vector<1x256xf32>
    %21 = vector.broadcast %20 : vector<1x256xf32> to vector<8x256xf32>
    %22 = arith.mulf %19, %21 : vector<8x256xf32>
    %c1_i32 = arith.constant 1 : i32
    %23 = tpu.dynamic_rotate %10 by %c1_i32 dim 1 : vector<8x256xf32>, i32 -> vector<8x256xf32>
    %24 = vector.extract_strided_slice %2 {offsets = [3, 0], sizes = [1, 256], strides = [1, 1]} : vector<9x256xf32> to vector<1x256xf32>
    %25 = vector.broadcast %24 : vector<1x256xf32> to vector<8x256xf32>
    %26 = arith.mulf %23, %25 : vector<8x256xf32>
    %c255_i32 = arith.constant 255 : i32
    %27 = tpu.dynamic_rotate %10 by %c255_i32 dim 1 : vector<8x256xf32>, i32 -> vector<8x256xf32>
    %28 = vector.extract_strided_slice %2 {offsets = [5, 0], sizes = [1, 256], strides = [1, 1]} : vector<9x256xf32> to vector<1x256xf32>
    %29 = vector.broadcast %28 : vector<1x256xf32> to vector<8x256xf32>
    %30 = arith.mulf %27, %29 : vector<8x256xf32>
    %c241_i32 = arith.constant 241 : i32
    %31 = tpu.dynamic_rotate %10 by %c241_i32 dim 1 : vector<8x256xf32>, i32 -> vector<8x256xf32>
    %32 = vector.extract_strided_slice %2 {offsets = [6, 0], sizes = [1, 256], strides = [1, 1]} : vector<9x256xf32> to vector<1x256xf32>
    %33 = vector.broadcast %32 : vector<1x256xf32> to vector<8x256xf32>
    %34 = arith.mulf %31, %33 : vector<8x256xf32>
    %c240_i32 = arith.constant 240 : i32
    %35 = tpu.dynamic_rotate %10 by %c240_i32 dim 1 : vector<8x256xf32>, i32 -> vector<8x256xf32>
    %36 = vector.extract_strided_slice %2 {offsets = [7, 0], sizes = [1, 256], strides = [1, 1]} : vector<9x256xf32> to vector<1x256xf32>
    %37 = vector.broadcast %36 : vector<1x256xf32> to vector<8x256xf32>
    %38 = arith.mulf %35, %37 : vector<8x256xf32>
    %c239_i32 = arith.constant 239 : i32
    %39 = tpu.dynamic_rotate %10 by %c239_i32 dim 1 : vector<8x256xf32>, i32 -> vector<8x256xf32>
    %40 = vector.extract_strided_slice %2 {offsets = [8, 0], sizes = [1, 256], strides = [1, 1]} : vector<9x256xf32> to vector<1x256xf32>
    %41 = vector.broadcast %40 : vector<1x256xf32> to vector<8x256xf32>
    %42 = arith.mulf %39, %41 : vector<8x256xf32>
    %43 = tpu.concatenate %14, %18, %22, %26, %10, %30, %34, %38, %42 in 0 : vector<8x256xf32>, vector<8x256xf32>, vector<8x256xf32>, vector<8x256xf32>, vector<8x256xf32>, vector<8x256xf32>, vector<8x256xf32>, vector<8x256xf32>, vector<8x256xf32> -> vector<72x256xf32>
    %c0_8 = arith.constant 0 : index
    %c0_9 = arith.constant 0 : index
    %44 = vector.load %arg11[%c0_8, %c0_9] : memref<16x72xf32, #tpu.memory_space<vmem>>, vector<16x72xf32>
    %cst_10 = arith.constant dense<0.000000e+00> : vector<16x256xf32>
    %45 = tpu.matmul %44, %43, %cst_10 {dimension_numbers = #tpu.dot_dimension_numbers<[1], [0], [0], [1], [0, 0, 1, 1], [], []>} : vector<16x72xf32>, vector<72x256xf32>, vector<16x256xf32> -> vector<16x256xf32>
    %46 = vector.extract_strided_slice %45 {offsets = [0, 0], sizes = [8, 256], strides = [1, 1]} : vector<16x256xf32> to vector<8x256xf32>
    %c0_11 = arith.constant 0 : index
    %c0_12 = arith.constant 0 : index
    %47 = vector.load %arg5[%c0_11, %c0_12] : memref<8x1xf32, #tpu.memory_space<vmem>>, vector<8x1xf32>
    %48 = vector.broadcast %47 : vector<8x1xf32> to vector<8x256xf32>
    %49 = arith.mulf %46, %48 : vector<8x256xf32>
    %c0_13 = arith.constant 0 : index
    %c0_14 = arith.constant 0 : index
    %50 = vector.load %arg6[%c0_13, %c0_14] : memref<8x1xf32, #tpu.memory_space<vmem>>, vector<8x1xf32>
    %51 = vector.broadcast %50 : vector<8x1xf32> to vector<8x256xf32>
    %52 = arith.addf %49, %51 : vector<8x256xf32>
    %cst_15 = arith.constant 0.000000e+00 : f32
    %53 = vector.broadcast %cst_15 : f32 to vector<8x256xf32>
    %54 = arith.maximumf %52, %53 : vector<8x256xf32>
    %c17_i32_16 = arith.constant 17 : i32
    %55 = tpu.dynamic_rotate %54 by %c17_i32_16 dim 1 : vector<8x256xf32>, i32 -> vector<8x256xf32>
    %56 = vector.extract_strided_slice %2 {offsets = [0, 0], sizes = [1, 256], strides = [1, 1]} : vector<9x256xf32> to vector<1x256xf32>
    %57 = vector.broadcast %56 : vector<1x256xf32> to vector<8x256xf32>
    %58 = arith.mulf %55, %57 : vector<8x256xf32>
    %c16_i32_17 = arith.constant 16 : i32
    %59 = tpu.dynamic_rotate %54 by %c16_i32_17 dim 1 : vector<8x256xf32>, i32 -> vector<8x256xf32>
    %60 = vector.extract_strided_slice %2 {offsets = [1, 0], sizes = [1, 256], strides = [1, 1]} : vector<9x256xf32> to vector<1x256xf32>
    %61 = vector.broadcast %60 : vector<1x256xf32> to vector<8x256xf32>
    %62 = arith.mulf %59, %61 : vector<8x256xf32>
    %c15_i32_18 = arith.constant 15 : i32
    %63 = tpu.dynamic_rotate %54 by %c15_i32_18 dim 1 : vector<8x256xf32>, i32 -> vector<8x256xf32>
    %64 = vector.extract_strided_slice %2 {offsets = [2, 0], sizes = [1, 256], strides = [1, 1]} : vector<9x256xf32> to vector<1x256xf32>
    %65 = vector.broadcast %64 : vector<1x256xf32> to vector<8x256xf32>
    %66 = arith.mulf %63, %65 : vector<8x256xf32>
    %c1_i32_19 = arith.constant 1 : i32
    %67 = tpu.dynamic_rotate %54 by %c1_i32_19 dim 1 : vector<8x256xf32>, i32 -> vector<8x256xf32>
    %68 = vector.extract_strided_slice %2 {offsets = [3, 0], sizes = [1, 256], strides = [1, 1]} : vector<9x256xf32> to vector<1x256xf32>
    %69 = vector.broadcast %68 : vector<1x256xf32> to vector<8x256xf32>
    %70 = arith.mulf %67, %69 : vector<8x256xf32>
    %c255_i32_20 = arith.constant 255 : i32
    %71 = tpu.dynamic_rotate %54 by %c255_i32_20 dim 1 : vector<8x256xf32>, i32 -> vector<8x256xf32>
    %72 = vector.extract_strided_slice %2 {offsets = [5, 0], sizes = [1, 256], strides = [1, 1]} : vector<9x256xf32> to vector<1x256xf32>
    %73 = vector.broadcast %72 : vector<1x256xf32> to vector<8x256xf32>
    %74 = arith.mulf %71, %73 : vector<8x256xf32>
    %c241_i32_21 = arith.constant 241 : i32
    %75 = tpu.dynamic_rotate %54 by %c241_i32_21 dim 1 : vector<8x256xf32>, i32 -> vector<8x256xf32>
    %76 = vector.extract_strided_slice %2 {offsets = [6, 0], sizes = [1, 256], strides = [1, 1]} : vector<9x256xf32> to vector<1x256xf32>
    %77 = vector.broadcast %76 : vector<1x256xf32> to vector<8x256xf32>
    %78 = arith.mulf %75, %77 : vector<8x256xf32>
    %c240_i32_22 = arith.constant 240 : i32
    %79 = tpu.dynamic_rotate %54 by %c240_i32_22 dim 1 : vector<8x256xf32>, i32 -> vector<8x256xf32>
    %80 = vector.extract_strided_slice %2 {offsets = [7, 0], sizes = [1, 256], strides = [1, 1]} : vector<9x256xf32> to vector<1x256xf32>
    %81 = vector.broadcast %80 : vector<1x256xf32> to vector<8x256xf32>
    %82 = arith.mulf %79, %81 : vector<8x256xf32>
    %c239_i32_23 = arith.constant 239 : i32
    %83 = tpu.dynamic_rotate %54 by %c239_i32_23 dim 1 : vector<8x256xf32>, i32 -> vector<8x256xf32>
    %84 = vector.extract_strided_slice %2 {offsets = [8, 0], sizes = [1, 256], strides = [1, 1]} : vector<9x256xf32> to vector<1x256xf32>
    %85 = vector.broadcast %84 : vector<1x256xf32> to vector<8x256xf32>
    %86 = arith.mulf %83, %85 : vector<8x256xf32>
    %87 = tpu.concatenate %58, %62, %66, %70, %54, %74, %78, %82, %86 in 0 : vector<8x256xf32>, vector<8x256xf32>, vector<8x256xf32>, vector<8x256xf32>, vector<8x256xf32>, vector<8x256xf32>, vector<8x256xf32>, vector<8x256xf32>, vector<8x256xf32> -> vector<72x256xf32>
    %c0_24 = arith.constant 0 : index
    %c0_25 = arith.constant 0 : index
    %88 = vector.load %arg12[%c0_24, %c0_25] : memref<16x72xf32, #tpu.memory_space<vmem>>, vector<16x72xf32>
    %cst_26 = arith.constant dense<0.000000e+00> : vector<16x256xf32>
    %89 = tpu.matmul %88, %87, %cst_26 {dimension_numbers = #tpu.dot_dimension_numbers<[1], [0], [0], [1], [0, 0, 1, 1], [], []>} : vector<16x72xf32>, vector<72x256xf32>, vector<16x256xf32> -> vector<16x256xf32>
    %90 = vector.extract_strided_slice %89 {offsets = [8, 0], sizes = [8, 256], strides = [1, 1]} : vector<16x256xf32> to vector<8x256xf32>
    %c0_27 = arith.constant 0 : index
    %c0_28 = arith.constant 0 : index
    %91 = vector.load %arg7[%c0_27, %c0_28] : memref<8x1xf32, #tpu.memory_space<vmem>>, vector<8x1xf32>
    %92 = vector.broadcast %91 : vector<8x1xf32> to vector<8x256xf32>
    %93 = arith.mulf %90, %92 : vector<8x256xf32>
    %c0_29 = arith.constant 0 : index
    %c0_30 = arith.constant 0 : index
    %94 = vector.load %arg8[%c0_29, %c0_30] : memref<8x1xf32, #tpu.memory_space<vmem>>, vector<8x1xf32>
    %95 = vector.broadcast %94 : vector<8x1xf32> to vector<8x256xf32>
    %96 = arith.addf %93, %95 : vector<8x256xf32>
    %cst_31 = arith.constant 0.000000e+00 : f32
    %97 = vector.broadcast %cst_31 : f32 to vector<8x256xf32>
    %98 = arith.maximumf %96, %97 : vector<8x256xf32>
    %c17_i32_32 = arith.constant 17 : i32
    %99 = tpu.dynamic_rotate %98 by %c17_i32_32 dim 1 : vector<8x256xf32>, i32 -> vector<8x256xf32>
    %100 = vector.extract_strided_slice %2 {offsets = [0, 0], sizes = [1, 256], strides = [1, 1]} : vector<9x256xf32> to vector<1x256xf32>
    %101 = vector.broadcast %100 : vector<1x256xf32> to vector<8x256xf32>
    %102 = arith.mulf %99, %101 : vector<8x256xf32>
    %c16_i32_33 = arith.constant 16 : i32
    %103 = tpu.dynamic_rotate %98 by %c16_i32_33 dim 1 : vector<8x256xf32>, i32 -> vector<8x256xf32>
    %104 = vector.extract_strided_slice %2 {offsets = [1, 0], sizes = [1, 256], strides = [1, 1]} : vector<9x256xf32> to vector<1x256xf32>
    %105 = vector.broadcast %104 : vector<1x256xf32> to vector<8x256xf32>
    %106 = arith.mulf %103, %105 : vector<8x256xf32>
    %c15_i32_34 = arith.constant 15 : i32
    %107 = tpu.dynamic_rotate %98 by %c15_i32_34 dim 1 : vector<8x256xf32>, i32 -> vector<8x256xf32>
    %108 = vector.extract_strided_slice %2 {offsets = [2, 0], sizes = [1, 256], strides = [1, 1]} : vector<9x256xf32> to vector<1x256xf32>
    %109 = vector.broadcast %108 : vector<1x256xf32> to vector<8x256xf32>
    %110 = arith.mulf %107, %109 : vector<8x256xf32>
    %c1_i32_35 = arith.constant 1 : i32
    %111 = tpu.dynamic_rotate %98 by %c1_i32_35 dim 1 : vector<8x256xf32>, i32 -> vector<8x256xf32>
    %112 = vector.extract_strided_slice %2 {offsets = [3, 0], sizes = [1, 256], strides = [1, 1]} : vector<9x256xf32> to vector<1x256xf32>
    %113 = vector.broadcast %112 : vector<1x256xf32> to vector<8x256xf32>
    %114 = arith.mulf %111, %113 : vector<8x256xf32>
    %c255_i32_36 = arith.constant 255 : i32
    %115 = tpu.dynamic_rotate %98 by %c255_i32_36 dim 1 : vector<8x256xf32>, i32 -> vector<8x256xf32>
    %116 = vector.extract_strided_slice %2 {offsets = [5, 0], sizes = [1, 256], strides = [1, 1]} : vector<9x256xf32> to vector<1x256xf32>
    %117 = vector.broadcast %116 : vector<1x256xf32> to vector<8x256xf32>
    %118 = arith.mulf %115, %117 : vector<8x256xf32>
    %c241_i32_37 = arith.constant 241 : i32
    %119 = tpu.dynamic_rotate %98 by %c241_i32_37 dim 1 : vector<8x256xf32>, i32 -> vector<8x256xf32>
    %120 = vector.extract_strided_slice %2 {offsets = [6, 0], sizes = [1, 256], strides = [1, 1]} : vector<9x256xf32> to vector<1x256xf32>
    %121 = vector.broadcast %120 : vector<1x256xf32> to vector<8x256xf32>
    %122 = arith.mulf %119, %121 : vector<8x256xf32>
    %c240_i32_38 = arith.constant 240 : i32
    %123 = tpu.dynamic_rotate %98 by %c240_i32_38 dim 1 : vector<8x256xf32>, i32 -> vector<8x256xf32>
    %124 = vector.extract_strided_slice %2 {offsets = [7, 0], sizes = [1, 256], strides = [1, 1]} : vector<9x256xf32> to vector<1x256xf32>
    %125 = vector.broadcast %124 : vector<1x256xf32> to vector<8x256xf32>
    %126 = arith.mulf %123, %125 : vector<8x256xf32>
    %c239_i32_39 = arith.constant 239 : i32
    %127 = tpu.dynamic_rotate %98 by %c239_i32_39 dim 1 : vector<8x256xf32>, i32 -> vector<8x256xf32>
    %128 = vector.extract_strided_slice %2 {offsets = [8, 0], sizes = [1, 256], strides = [1, 1]} : vector<9x256xf32> to vector<1x256xf32>
    %129 = vector.broadcast %128 : vector<1x256xf32> to vector<8x256xf32>
    %130 = arith.mulf %127, %129 : vector<8x256xf32>
    %131 = tpu.concatenate %102, %106, %110, %114, %98, %118, %122, %126, %130 in 0 : vector<8x256xf32>, vector<8x256xf32>, vector<8x256xf32>, vector<8x256xf32>, vector<8x256xf32>, vector<8x256xf32>, vector<8x256xf32>, vector<8x256xf32>, vector<8x256xf32> -> vector<72x256xf32>
    %c0_40 = arith.constant 0 : index
    %c0_41 = arith.constant 0 : index
    %132 = vector.load %arg13[%c0_40, %c0_41] : memref<16x72xf32, #tpu.memory_space<vmem>>, vector<16x72xf32>
    %cst_42 = arith.constant dense<0.000000e+00> : vector<16x256xf32>
    %133 = tpu.matmul %132, %131, %cst_42 {dimension_numbers = #tpu.dot_dimension_numbers<[1], [0], [0], [1], [0, 0, 1, 1], [], []>} : vector<16x72xf32>, vector<72x256xf32>, vector<16x256xf32> -> vector<16x256xf32>
    %c0_43 = arith.constant 0 : index
    %c0_44 = arith.constant 0 : index
    %134 = vector.load %arg9[%c0_43, %c0_44] : memref<8x1xf32, #tpu.memory_space<vmem>>, vector<8x1xf32>
    %135 = vector.broadcast %134 : vector<8x1xf32> to vector<8x256xf32>
    %136 = arith.mulf %1, %135 : vector<8x256xf32>
    %c0_45 = arith.constant 0 : index
    %c0_46 = arith.constant 0 : index
    %137 = vector.load %arg10[%c0_45, %c0_46] : memref<8x1xf32, #tpu.memory_space<vmem>>, vector<8x1xf32>
    %138 = vector.broadcast %137 : vector<8x1xf32> to vector<8x256xf32>
    %139 = arith.addf %136, %138 : vector<8x256xf32>
    %cst_47 = arith.constant 0.000000e+00 : f32
    %140 = vector.broadcast %cst_47 : f32 to vector<8x256xf32>
    %141 = arith.maximumf %139, %140 : vector<8x256xf32>
    %c0_48 = arith.constant 0 : index
    %c0_49 = arith.constant 0 : index
    %142 = vector.load %arg14[%c0_48, %c0_49] : memref<16x8xf32, #tpu.memory_space<vmem>>, vector<16x8xf32>
    %cst_50 = arith.constant dense<0.000000e+00> : vector<16x256xf32>
    %143 = tpu.matmul %142, %141, %cst_50 {dimension_numbers = #tpu.dot_dimension_numbers<[1], [0], [0], [1], [0, 0, 1, 1], [], []>} : vector<16x8xf32>, vector<8x256xf32>, vector<16x256xf32> -> vector<16x256xf32>
    %144 = arith.addf %143, %45 : vector<16x256xf32>
    %145 = arith.addf %144, %89 : vector<16x256xf32>
    %146 = arith.addf %145, %133 : vector<16x256xf32>
    %c0_51 = arith.constant 0 : index
    %c0_52 = arith.constant 0 : index
    %c0_53 = arith.constant 0 : index
    %147 = vector.load %arg15[%c0_51, %c0_52, %c0_53] : memref<1x16x256xf32, #tpu.memory_space<vmem>>, vector<1x16x256xf32>
    %148 = vector.shape_cast %147 : vector<1x16x256xf32> to vector<16x256xf32>
    %149 = vector.shape_cast %146 : vector<16x256xf32> to vector<1x16x256xf32>
    tpu.vector_store %arg15[%c0_51, %c0_52, %c0_53], %149 {strides = array<i32>} : memref<1x16x256xf32, #tpu.memory_space<vmem>>, vector<1x16x256xf32>,
    return
  }
  func.func @transform_0(%arg0: i32) -> (i32, i32, i32) {
    %c0_i32 = arith.constant 0 : i32
    %c0_i32_0 = arith.constant 0 : i32
    %c0_i32_1 = arith.constant 0 : i32
    return %arg0, %c0_i32, %c0_i32_0 : i32, i32, i32
  }
  func.func @transform_1(%arg0: i32) -> (i32, i32) {
    %c0_i32 = arith.constant 0 : i32
    %c0_i32_0 = arith.constant 0 : i32
    %c0_i32_1 = arith.constant 0 : i32
    return %c0_i32, %c0_i32_0 : i32, i32
  }
  func.func @transform_2(%arg0: i32) -> (i32, i32) {
    %c0_i32 = arith.constant 0 : i32
    %c0_i32_0 = arith.constant 0 : i32
    %c0_i32_1 = arith.constant 0 : i32
    return %c0_i32, %c0_i32_0 : i32, i32
  }
  func.func @transform_3(%arg0: i32) -> (i32, i32) {
    %c0_i32 = arith.constant 0 : i32
    %c0_i32_0 = arith.constant 0 : i32
    %c0_i32_1 = arith.constant 0 : i32
    return %c0_i32, %c0_i32_0 : i32, i32
  }
  func.func @transform_4(%arg0: i32) -> (i32, i32) {
    %c0_i32 = arith.constant 0 : i32
    %c0_i32_0 = arith.constant 0 : i32
    %c0_i32_1 = arith.constant 0 : i32
    return %c0_i32, %c0_i32_0 : i32, i32
  }
  func.func @transform_5(%arg0: i32) -> (i32, i32) {
    %c0_i32 = arith.constant 0 : i32
    %c0_i32_0 = arith.constant 0 : i32
    %c0_i32_1 = arith.constant 0 : i32
    return %c0_i32, %c0_i32_0 : i32, i32
  }
  func.func @transform_6(%arg0: i32) -> (i32, i32) {
    %c0_i32 = arith.constant 0 : i32
    %c0_i32_0 = arith.constant 0 : i32
    %c0_i32_1 = arith.constant 0 : i32
    return %c0_i32, %c0_i32_0 : i32, i32
  }
  func.func @transform_7(%arg0: i32) -> (i32, i32) {
    %c0_i32 = arith.constant 0 : i32
    %c0_i32_0 = arith.constant 0 : i32
    %c0_i32_1 = arith.constant 0 : i32
    return %c0_i32, %c0_i32_0 : i32, i32
  }
  func.func @transform_8(%arg0: i32) -> (i32, i32) {
    %c0_i32 = arith.constant 0 : i32
    %c0_i32_0 = arith.constant 0 : i32
    %c0_i32_1 = arith.constant 0 : i32
    return %c0_i32, %c0_i32_0 : i32, i32
  }
  func.func @transform_9(%arg0: i32) -> (i32, i32) {
    %c0_i32 = arith.constant 0 : i32
    %c0_i32_0 = arith.constant 0 : i32
    %c0_i32_1 = arith.constant 0 : i32
    return %c0_i32, %c0_i32_0 : i32, i32
  }
  func.func @transform_10(%arg0: i32) -> (i32, i32) {
    %c0_i32 = arith.constant 0 : i32
    %c0_i32_0 = arith.constant 0 : i32
    %c0_i32_1 = arith.constant 0 : i32
    return %c0_i32, %c0_i32_0 : i32, i32
  }
  func.func @transform_11(%arg0: i32) -> (i32, i32) {
    %c0_i32 = arith.constant 0 : i32
    %c0_i32_0 = arith.constant 0 : i32
    %c0_i32_1 = arith.constant 0 : i32
    return %c0_i32, %c0_i32_0 : i32, i32
  }
  func.func @transform_12(%arg0: i32) -> (i32, i32) {
    %c0_i32 = arith.constant 0 : i32
    %c0_i32_0 = arith.constant 0 : i32
    %c0_i32_1 = arith.constant 0 : i32
    return %c0_i32, %c0_i32_0 : i32, i32
  }
  func.func @transform_13(%arg0: i32) -> (i32, i32) {
    %c0_i32 = arith.constant 0 : i32
    %c0_i32_0 = arith.constant 0 : i32
    %c0_i32_1 = arith.constant 0 : i32
    return %c0_i32, %c0_i32_0 : i32, i32
  }
  func.func @transform_14(%arg0: i32) -> (i32, i32, i32) {
    %c0_i32 = arith.constant 0 : i32
    %c0_i32_0 = arith.constant 0 : i32
    %c0_i32_1 = arith.constant 0 : i32
    return %arg0, %c0_i32, %c0_i32_0 : i32, i32, i32
  }
}

</mosaic_0001>

<bundles_post_ra>
// kernel: tpu_custom_call.1
= control target key start
LH: loop header
LB: loop body
LE: loop exit
PB: predicated region body
PF: predicated region fallthrough
CT: control target
= control target key end

     0   :  { %s2060_s0 = inlined_call_operand.vmem [shape: f32[2,8,256], index: 0, kind: input, shape index: {}]   ;;  %s2061_s1 = inlined_call_operand.vmem [shape: f32[9,256], index: 1, kind: input, shape index: {}]   ;;  %s2062_s2 = inlined_call_operand.vmem [shape: f32[8,1], index: 2, kind: input, shape index: {}]   ;;  %s2063_s3 = inlined_call_operand.vmem [shape: f32[8,1], index: 3, kind: input, shape index: {}]   ;;  %s2064_s4 = inlined_call_operand.vmem [shape: f32[8,1], index: 4, kind: input, shape index: {}]   ;;  %s2065_s5 = inlined_call_operand.vmem [shape: f32[8,1], index: 5, kind: input, shape index: {}]   ;;  %s2066_s6 = inlined_call_operand.vmem [shape: f32[8,1], index: 6, kind: input, shape index: {}]   ;;  %s2067_s7 = inlined_call_operand.vmem [shape: f32[8,1], index: 7, kind: input, shape index: {}]   ;;  %s2068_s8 = inlined_call_operand.vmem [shape: f32[8,1], index: 8, kind: input, shape index: {}]   ;;  %s2069_s9 = inlined_call_operand.vmem [shape: f32[8,1], index: 9, kind: input, shape index: {}]   ;;  %s2070_s10 = inlined_call_operand.vmem [shape: f32[16,72], index: 10, kind: input, shape index: {}]   ;;  %s2071_s11 = inlined_call_operand.vmem [shape: f32[16,72], index: 11, kind: input, shape index: {}]   ;;  %s2072_s12 = inlined_call_operand.vmem [shape: f32[16,72], index: 12, kind: input, shape index: {}]   ;;  %s2073_s13 = inlined_call_operand.vmem [shape: f32[16,8], index: 13, kind: input, shape index: {}]   ;;  %s2074_s14 = inlined_call_operand.hbm [shape: f32[2,16,256], index: 14, kind: output, shape index: {}]  }
   0x1   :  { %2088 = sst [smem:[#allocation7_spill]] %s2060_s0 }
   0x2   :  { %2089 = sst [smem:[#allocation8_spill]] %s2061_s1 }
   0x3   :  { %2090 = sst [smem:[#allocation9_spill]] %s2062_s2 }
   0x4   :  { %19 = vsyncpa [#allocation3], 0 }
   0x5   :  { %21 = vsyncpa [#allocation3 + $0x1], 0  ;;  %s1527_s29 = smov 0   ;;  %s1529_s30 = smov 0  }
   0x6   :  { %s1531_s15 = smov 0   ;;  %s1533_s16 = smov 0  }
   0x7 LB: > { %2091 = sst [smem:[#allocation5_spill]] %s1434_s15  ;;  %s1548_s17 = sadd.s32 4294967295, %s1438_s16   ;;  %s1438_s16 = sphi %s1533_s16, %s2108_s16   ;;  %s1434_s15 = sphi %s1531_s15, %s2105_s15   ;;  %s1430_s30 = sphi %s1529_s30, %s2107_s30   ;;  %s1426_s29 = sphi %s1527_s29, %s2106_s29  }
   0x8   : > { %s1240_s18 = sadd.s32 4294967294, %s1438_s16   ;;  %s1552_s19 = sadd.s32 1, %s1438_s16  }
   0x9   : > { %s333_s20 = sadd.s32 1, %s1434_s15  ;;  %s330_s21 = ssub.s32 %s1438_s16, %s1552_s19 }
   0xa   : > { %p343_p0 = scmp.ne.s32.totalorder %s1434_s15, %s1430_s30  ;;  %p331_p1 = scmp.eq.s32.totalorder %s330_s21, 0 }
   0xb   : > { %p344_p2 = scmp.eq.s32.totalorder %s1548_s17, 1  ;;  %p349_p3 = scmp.ne.s32.totalorder %s1430_s30, %s1426_s29 }
   0xc   : > { %p350_p4 = scmp.eq.s32.totalorder %s1240_s18, 1  ;;  %p1243_p7 = scmp.ge.s32.totalorder %s1438_s16, 1 }
   0xd   : > { %s1563_s22 = scalar_select %p331_p1, %s1434_s15, %s333_s20  }
   0xe   : > { %p1565_p5 = por %p344_p2, %p343_p0  ;;  %p1569_p6 = por %p350_p4, %p349_p3 }
   0xf   : > { %2092 = sst [smem:[#allocation6_spill]] %s1563_s22  ;;  %p415_p8 = scmp.lt.s32.totalorder %s1438_s16, 3 }
  0x11   : > { %p416_p9 = pnand %p1243_p7, %p415_p8 }
  0x12   : > { %s2095_s2 = sld [smem:[#allocation9_spill]] (!%p416_p9)  ;;  %v1440_v1 = vmov (!%p416_p9), 0   ;;  %v480_v2 = vld [vmem:[%s2063_s3] sm:$0xff] (!%p416_p9)  ;;  %p461_p10 = scmp.lt.s32.totalorder (!%p416_p9), %s1548_s17, 1  ;;  %v1449_v14 = vmov (!%p416_p9), 0.0   ;;  %v494_v16 = vlaneseq (!%p416_p9)  ;;  %vm630_vm8 = vcmask (!%p416_p9), 588800  }
  0x13   : > { %419 = sbr.rel (%p416_p9) target bundleno = 1313 (0x521), region = 76  ;;  %1374 = vset.pattern.permute.xlu0 (!%p416_p9), %v1440_v1  ;;  %1375 = vset.pattern.permute.xlu1 (!%p416_p9), %v1440_v1  ;;  %s2096_s0 = sld [smem:[#allocation7_spill]] (!%p416_p9)  ;;  %v714_v13 = vld [vmem:[%s2064_s4] sm:$0xff] (!%p416_p9)  ;;  %vm1068_vm9 = vcmask (!%p416_p9), 64512  }
  0x14   : > { %s2084_s25 = smov (!%p416_p9), 16   ;;  %s2086_s22 = smov (!%p416_p9), 17   ;;  %701 = vmatprep.mubr.f32.mxu1 (!%p416_p9), %v1449_v14  ;;  %1035 = vmatprep.mubr.f32.mxu0 (!%p416_p9), %v1449_v14  ;;  %v722_v15 = vld [vmem:[%s2065_s5] sm:$0xff] (!%p416_p9)  ;;  %v1636_v17 = vshrl.u32 (!%p416_p9), %v494_v16, 7  ;;  %v1638_v20 = vand.u32 (!%p416_p9), 127, %v494_v16 }
  0x15   : > { %s2080_s26 = smov (!%p416_p9), 1   ;;  %s2078_s27 = smov (!%p416_p9), 127  }
  0x16   : > { %s1446_s28 = smov (!%p416_p9), 113   ;;  %v501_v21 = vsub.s32 (!%p416_p9), 0, %v1636_v17  ;;  %s2097_s1 = sld [smem:[#allocation8_spill]] (!%p416_p9)  ;;  %v518_v23 = vsub.s32 (!%p416_p9), 1, %v1636_v17  ;;  %vm496_vm0 = vcmp.lt.s32.totalorder (!%p416_p9), %v1638_v20, 17  ;;  %vm513_vm1 = vcmp.lt.s32.totalorder (!%p416_p9), %v1638_v20, 16 }
  0x17   : > { %v535_v37 = vsub.s32 (!%p416_p9), 2, %v1636_v17  ;;  %v552_v38 = vsub.s32 (!%p416_p9), 3, %v1636_v17  ;;  %vm530_vm2 = vcmp.lt.s32.totalorder (!%p416_p9), %v1638_v20, 15  ;;  %v569_v47 = vsub.s32 (!%p416_p9), 5, %v1636_v17  ;;  %s2100_s21 = smov (!%p416_p9), 127  }
  0x18   : > { %v472_v0 = vld [vmem:[%s2095_s2] sm:$0xff] (!%p416_p9)  ;;  %vm547_vm3 = vcmp.lt.s32.totalorder (!%p416_p9), %v1638_v20, 1  ;;  %vm564_vm4 = vcmp.lt.s32.totalorder (!%p416_p9), %v1638_v20, 127  ;;  %vm581_vm5 = vcmp.lt.s32.totalorder (!%p416_p9), %v1638_v20, 113  ;;  %vm598_vm6 = vcmp.lt.s32.totalorder (!%p416_p9), %v1638_v20, 112 }
  0x19   : > { %475 = vperm.xlu0 (!%p416_p9), %1374, %v472_v0   ;;  %vm615_vm7 = vcmp.lt.s32.totalorder (!%p416_p9), %v1638_v20, 111  ;;  %v964_v20 = vld [vmem:[%s2072_s12 + $0x8] sm:$0xff] (!%p416_p9) }
  0x1a   : > { %s462_s18 = scalar_select %p461_p10, %s1548_s17, 1 }
  0x1c   : > { %s1262_s20 = sshll.u32 %s462_s18, 4  ;;  %s1447_s18 = smov 112   ;;  %v1644_v22 = vld [vmem:[%s2097_s1] sm:$0xff]  ;;  %v1650_v24 = vld [vmem:[%s2097_s1 + $0x8] sm:$0xff] }
  0x1d   : > { %483 = vperm.xlu0 %1374, %v480_v2   ;;  %s465_s15 = scalar_lea.vmem %s2096_s0, %s1262_s20  ;;  %s2082_s20 = smov 111   ;;  %v1654_v27 = vrot.slane %v1644_v22, %v501_v21  ;;  %v1658_v28 = vrot.slane %v1644_v22, %v518_v23  ;;  %v1661_v29 = vrot.slane %v1650_v24, %v501_v21  ;;  %v1664_v30 = vrot.slane %v1650_v24, %v518_v23 }
  0x1e   : > { %v1586_v4 = vld [vmem:[%s465_s15] sm:$0xff]  ;;  %v1588_v5 = vld [vmem:[%s465_s15 + $0x8] sm:$0xff]  ;;  %s2076_s15 = smov 15   ;;  %v1682_v46 = vrot.slane %v1644_v22, %v535_v37  ;;  %v1686_v49 = vrot.slane %v1650_v24, %v535_v37  ;;  %v1690_v50 = vrot.slane %v1644_v22, %v552_v38  ;;  %v1693_v51 = vrot.slane %v1650_v24, %v552_v38  ;;  %s2102_s0 = smov 17  }
  0x1f   : > { %v1705_v57 = vrot.slane %v1644_v22, %v569_v47  ;;  %v1708_v58 = vrot.slane %v1650_v24, %v569_v47 }
  0x98   : > { %v476_v3 = vpop.permute.xlu0 %475 }
  0x99   : > { %v478_v6 = vmul.f32 %v476_v3, %v1586_v4  ;;  %v479_v8 = vmul.f32 %v476_v3, %v1588_v5 }
  0x9c   : > { %v484_v7 = vpop.permute.xlu0 %483 }
  0x9d   : > { %v486_v9 = vadd.f32 %v484_v7, %v478_v6  ;;  %v487_v10 = vadd.f32 %v484_v7, %v479_v8  ;;  %v586_v7 = vsub.s32 6, %v1636_v17 }
  0x9f   : > { %v1592_v11 = vmax.f32 %v486_v9, 0.0  ;;  %v1598_v12 = vmax.f32 %v487_v10, 0.0  ;;  %v603_v10 = vsub.s32 7, %v1636_v17  ;;  %v1729_v21 = vrot.slane %v1650_v24, %v586_v7 }
  0xa1   : > { %509 = vrot.lane.b32.xlu0 %v1592_v11, %s2084_s25  ;;  %490 = vrot.lane.b32.xlu1 %v1592_v11, %s2086_s22  ;;  %v1733_v17 = vrot.slane %v1644_v22, %v603_v10  ;;  %v1736_v23 = vrot.slane %v1650_v24, %v603_v10 }
  0xa5   : > { %526 = vrot.lane.b32.xlu0 %v1592_v11, %s2076_s15  ;;  %492 = vrot.lane.b32.xlu1 %v1598_v12, %s2086_s22 }
  0xa9   : > { %543 = vrot.lane.b32.xlu0 %v1592_v11, %s2080_s26  ;;  %511 = vrot.lane.b32.xlu1 %v1598_v12, %s2084_s25 }
  0xad   : > { %560 = vrot.lane.b32.xlu0 %v1592_v11, %s2078_s27  ;;  %528 = vrot.lane.b32.xlu1 %v1598_v12, %s2076_s15  ;;  %s2099_s15 = smov 1  }
  0xb1   : > { %577 = vrot.lane.b32.xlu0 %v1592_v11, %s1446_s28  ;;  %545 = vrot.lane.b32.xlu1 %v1598_v12, %s2080_s26  ;;  %s458_s26 = sand.u32 1, %s1430_s30  }
  0xb5   : > { %594 = vrot.lane.b32.xlu0 %v1592_v11, %s1447_s18  ;;  %562 = vrot.lane.b32.xlu1 %v1598_v12, %s2078_s27  ;;  %s1263_s27 = sshll.u32 %s1548_s17, 9  ;;  %s2018_s17 = scalar_lea.sflag [#allocation3], %s458_s26 }
  0xb9   : > { %611 = vrot.lane.b32.xlu0 %v1592_v11, %s2082_s20  ;;  %579 = vrot.lane.b32.xlu1 %v1598_v12, %s1446_s28 }
  0xbd   : > { %717 = vperm.xlu0 %1374, %v714_v13   ;;  %596 = vrot.lane.b32.xlu1 %v1598_v12, %s1447_s18 }
  0xc1   : > { %613 = vrot.lane.b32.xlu1 %v1598_v12, %s2082_s20  ;;  %s2098_s20 = smov 15  }
  0xc5   : > { %725 = vperm.xlu1 %1375, %v722_v15  }
 0x113   : > { %v510_v18 = vpop.permute.xlu0 %509  ;;  %v491_v19 = vpop.permute.xlu1 %490 }
 0x117   : > { %v527_v25 = vpop.permute.xlu0 %526  ;;  %v493_v26 = vpop.permute.xlu1 %492 }
 0x118   : > { %v497_v31 = vsel %vm496_vm0, %v491_v19, %v493_v26  ;;  %v498_v32 = vsel %vm496_vm0, %v493_v26, %v491_v19 }
 0x119   : > { %v507_v39 = vmul.f32 %v1654_v27, %v498_v32  ;;  %v508_v41 = vmul.f32 %v1661_v29, %v497_v31 }
 0x11b   : > { %v544_v33 = vpop.permute.xlu0 %543  ;;  %v512_v34 = vpop.permute.xlu1 %511 }
 0x11c   : > { %v514_v35 = vsel %vm513_vm1, %v510_v18, %v512_v34  ;;  %v515_v36 = vsel %vm513_vm1, %v512_v34, %v510_v18  ;;  %v1726_v18 = vrot.slane %v1644_v22, %v586_v7  ;;  %v1754_v34 = vld [vmem:[%s2097_s1 + $0x18] ss:$0 sm:$0xff] }
 0x11d   : > { %v524_v40 = vmul.f32 %v1658_v28, %v515_v36  ;;  %v525_v42 = vmul.f32 %v1664_v30, %v514_v35 }
 0x11f   : > { %v529_v43 = vpop.permute.xlu1 %528  ;;  %v1264_v44 = vpack.c.bf16 %v525_v42, %v508_v41  ;;  %v1266_v45 = vpack.c.bf16 %v524_v40, %v507_v39  ;;  %v561_v48 = vpop.permute.xlu0 %560  ;;  %v1761_v40 = vld [vmem:[%s2097_s1 + $0x10] ss:$0 sm:$0xff] }
 0x120   : > { %v531_v52 = vsel %vm530_vm2, %v527_v25, %v529_v43  ;;  %v532_v53 = vsel %vm530_vm2, %v529_v43, %v527_v25 }
 0x121   : > { %1265 = vmatprep.subr.bf16.mxu1 %v1264_v44  ;;  %v541_v59 = vmul.f32 %v1682_v46, %v532_v53  ;;  %v542_v60 = vmul.f32 %v1686_v49, %v531_v52  ;;  %v628_v44 = vld [vmem:[%s2070_s10] sm:$0xff] }
 0x122   : > { %1267 = vmatpush1.bf16.msra.mxu1 %v1266_v45 }
 0x123   : > { %v546_v54 = vpop.permute.xlu1 %545  ;;  %v578_v63 = vpop.permute.xlu0 %577 }
 0x124   : > { %v548_v55 = vsel %vm547_vm3, %v544_v33, %v546_v54  ;;  %v549_v56 = vsel %vm547_vm3, %v546_v54, %v544_v33 }
 0x125   : > { %v558_v61 = vmul.f32 %v1690_v50, %v549_v56  ;;  %v559_v62 = vmul.f32 %v1693_v51, %v548_v55 }
 0x127   : > { %v563_v0 = vpop.permute.xlu1 %562  ;;  %v1268_v1 = vpack.c.bf16 %v559_v62, %v542_v60  ;;  %v1270_v2 = vpack.c.bf16 %v558_v61, %v541_v59  ;;  %v595_v19 = vpop.permute.xlu0 %594  ;;  %v629_v61 = vld [vmem:[%s2070_s10 + $0x8] sm:$0xff]  ;;  %v881_v62 = vld [vmem:[%s2066_s6] sm:$0xff] }
 0x128   : > { %v565_v3 = vsel %vm564_vm4, %v561_v48, %v563_v0  ;;  %v566_v6 = vsel %vm564_vm4, %v563_v0, %v561_v48 }
 0x129   : > { %v575_v8 = vmul.f32 %v1705_v57, %v565_v3  ;;  %v576_v9 = vmul.f32 %v1708_v58, %v566_v6  ;;  %1269 = vmatprep.subr.bf16.mxu1 %v1268_v1 }
 0x12a   : > { %1271 = vmatpush1.bf16.msra.mxu1 %v1270_v2 }
 0x12b   : > { %v580_v13 = vpop.permute.xlu1 %579  ;;  %v1272_v15 = vpack.c.bf16 %v576_v9, %v1598_v12  ;;  %v1274_v16 = vpack.c.bf16 %v575_v8, %v1592_v11  ;;  %v612_v35 = vpop.permute.xlu0 %611 }
 0x12c   : > { %v582_v12 = vsel %vm581_vm5, %v578_v63, %v580_v13  ;;  %v583_v11 = vsel %vm581_vm5, %v580_v13, %v578_v63  ;;  %v889_v63 = vld [vmem:[%s2067_s7] sm:$0xff] }
 0x12d   : > { %1273 = vmatprep.subr.bf16.mxu1 %v1272_v15  ;;  %v592_v22 = vmul.f32 %v1726_v18, %v582_v12  ;;  %v593_v24 = vmul.f32 %v1729_v21, %v583_v11 }
 0x12e   : > { %1275 = vmatpush1.bf16.msra.mxu1 %v1274_v16 }
 0x12f   : > { %v597_v25 = vpop.permute.xlu1 %596 }
 0x130   : > { %v599_v26 = vsel %vm598_vm6, %v595_v19, %v597_v25  ;;  %v600_v31 = vsel %vm598_vm6, %v597_v25, %v595_v19 }
 0x131   : > { %v609_v32 = vmul.f32 %v1733_v17, %v599_v26  ;;  %v610_v33 = vmul.f32 %v1736_v23, %v600_v31 }
 0x133   : > { %v614_v36 = vpop.permute.xlu1 %613  ;;  %v1276_v37 = vpack.c.bf16 %v610_v33, %v593_v24  ;;  %v1278_v38 = vpack.c.bf16 %v609_v32, %v592_v22 }
 0x134   : > { %v617_v39 = vsel %vm615_vm7, %v614_v36, %v612_v35  ;;  %v616_v41 = vsel %vm615_vm7, %v612_v35, %v614_v36 }
 0x135   : > { %v627_v42 = vmul.f32 %v1754_v34, %v617_v39  ;;  %1277 = vmatprep.subr.bf16.mxu1 %v1276_v37  ;;  %v626_v43 = vmul.f32 %v1761_v40, %v616_v41 }
 0x136   : > { %1279 = vmatpush1.bf16.msra.mxu1 %v1278_v38 }
 0x137   : > { %653 = vmatprep.subr.mxu1 %v627_v42 }
 0x13a   : > { %654 = vmatpush1.msra.mxu1 %v626_v43 }
 0x13b   : > { %1249 = vmatmul.mubr.msk.f32.vlgmr.msra.gmra.mrb[0].mxu1 %vm630_vm8, %v628_v44 }
 0x13c   : > { %707 = vmatprep.mubr.f32.mxu1 %v1449_v14  ;;  %v718_v45 = vpop.permute.xlu0 %717 }
 0x13f   : > { %1250 = vmatmul.mubr.msk.f32.gmra.mrb[2].mxu1 %vm630_vm8, %v629_v61 }
 0x140   : > { %868 = vmatprep.mubr.f32.mxu1 %v1449_v14 }
 0x144   : > { %v726_v48 = vpop.permute.xlu1 %725 }
 0x20e   : > { %v1772_v47 = vpop.f32.mrb[0].mxu1 }
 0x20f   : > { %v720_v52 = vmul.f32 %v718_v45, %v1772_v47  ;;  %v1775_v53 = vpop.f32.mrb[1].mxu1 }
 0x210   : > { %v721_v54 = vmul.f32 %v718_v45, %v1775_v53 }
 0x211   : > { %v728_v55 = vadd.f32 %v726_v48, %v720_v52 }
 0x212   : > { %v729_v56 = vadd.f32 %v726_v48, %v721_v54 }
 0x213   : > { %v1778_v59 = vmax.f32 %v728_v55, 0.0 }
 0x214   : > { %v1780_v60 = vmax.f32 %v729_v56, 0.0 }
 0x215   : > { %732 = vrot.lane.b32.xlu0 %v1778_v59, %s2086_s22 }
 0x216   : > { %734 = vrot.lane.b32.xlu1 %v1780_v60, %s2086_s22  ;;  %s2103_s22 = smov 16  }
 0x219   : > { %740 = vrot.lane.b32.xlu0 %v1778_v59, %s2084_s25 }
 0x21a   : > { %742 = vrot.lane.b32.xlu1 %v1780_v60, %s2084_s25  ;;  %s2101_s25 = smov 111  }
 0x21d   : > { %748 = vrot.lane.b32.xlu0 %v1778_v59, %s2098_s20 }
 0x21e   : > { %750 = vrot.lane.b32.xlu1 %v1780_v60, %s2098_s20 }
 0x221   : > { %756 = vrot.lane.b32.xlu0 %v1778_v59, %s2099_s15 }
 0x222   : > { %758 = vrot.lane.b32.xlu1 %v1780_v60, %s2099_s15 }
 0x225   : > { %764 = vrot.lane.b32.xlu0 %v1778_v59, %s2100_s21 }
 0x226   : > { %766 = vrot.lane.b32.xlu1 %v1780_v60, %s2100_s21 }
 0x229   : > { %772 = vrot.lane.b32.xlu0 %v1778_v59, %s1446_s28 }
 0x22a   : > { %774 = vrot.lane.b32.xlu1 %v1780_v60, %s1446_s28 }
 0x22d   : > { %780 = vrot.lane.b32.xlu0 %v1778_v59, %s1447_s18 }
 0x22e   : > { %782 = vrot.lane.b32.xlu1 %v1780_v60, %s1447_s18 }
 0x231   : > { %788 = vrot.lane.b32.xlu0 %v1778_v59, %s2101_s25 }
 0x232   : > { %790 = vrot.lane.b32.xlu1 %v1780_v60, %s2101_s25 }
 0x235   : > { %884 = vperm.xlu0 %1374, %v881_v62  }
 0x236   : > { %892 = vperm.xlu1 %1375, %v889_v63  }
 0x287   : > { %v733_v0 = vpop.permute.xlu0 %732 }
 0x288   : > { %v735_v1 = vpop.permute.xlu1 %734 }
 0x289   : > { %v736_v2 = vsel %vm496_vm0, %v733_v0, %v735_v1  ;;  %v737_v3 = vsel %vm496_vm0, %v735_v1, %v733_v0 }
 0x28a   : > { %v738_v10 = vmul.f32 %v737_v3, %v1654_v27  ;;  %v739_v13 = vmul.f32 %v736_v2, %v1661_v29 }
 0x28b   : > { %v741_v6 = vpop.permute.xlu0 %740 }
 0x28c   : > { %v743_v7 = vpop.permute.xlu1 %742 }
 0x28d   : > { %v744_v8 = vsel %vm513_vm1, %v741_v6, %v743_v7  ;;  %v745_v9 = vsel %vm513_vm1, %v743_v7, %v741_v6 }
 0x28e   : > { %v746_v15 = vmul.f32 %v745_v9, %v1658_v28  ;;  %v747_v16 = vmul.f32 %v744_v8, %v1664_v30 }
 0x28f   : > { %v749_v19 = vpop.permute.xlu0 %748 }
 0x290   : > { %v1282_v12 = vpack.c.bf16 %v746_v15, %v738_v10  ;;  %v751_v11 = vpop.permute.xlu1 %750  ;;  %v1280_v25 = vpack.c.bf16 %v747_v16, %v739_v13 }
 0x291   : > { %v752_v26 = vsel %vm530_vm2, %v749_v19, %v751_v11  ;;  %v753_v31 = vsel %vm530_vm2, %v751_v11, %v749_v19  ;;  %v796_v11 = vld [vmem:[%s2071_s11] sm:$0xff] }
 0x292   : > { %1281 = vmatprep.subr.bf16.mxu1 %v1280_v25  ;;  %v754_v35 = vmul.f32 %v753_v31, %v1682_v46  ;;  %v755_v36 = vmul.f32 %v752_v26, %v1686_v49  ;;  %v797_v25 = vld [vmem:[%s2071_s11 + $0x8] sm:$0xff]  ;;  %v709_v26 = vpop.f32.mrb[2].mxu1 }
 0x293   : > { %1283 = vmatpush1.bf16.msra.mxu1 %v1282_v12  ;;  %v757_v22 = vpop.permute.xlu0 %756  ;;  %v711_v31 = vpop.f32.mrb[3].mxu1 }
 0x294   : > { %v759_v24 = vpop.permute.xlu1 %758 }
 0x295   : > { %v760_v32 = vsel %vm547_vm3, %v757_v22, %v759_v24  ;;  %v761_v33 = vsel %vm547_vm3, %v759_v24, %v757_v22 }
 0x296   : > { %v762_v37 = vmul.f32 %v761_v33, %v1690_v50  ;;  %v763_v38 = vmul.f32 %v760_v32, %v1693_v51 }
 0x297   : > { %v765_v39 = vpop.permute.xlu0 %764 }
 0x298   : > { %v1286_v41 = vpack.c.bf16 %v762_v37, %v754_v35  ;;  %v767_v42 = vpop.permute.xlu1 %766  ;;  %v1284_v43 = vpack.c.bf16 %v763_v38, %v755_v36 }
 0x299   : > { %v768_v44 = vsel %vm564_vm4, %v765_v39, %v767_v42  ;;  %v769_v45 = vsel %vm564_vm4, %v767_v42, %v765_v39 }
 0x29a   : > { %v770_v48 = vmul.f32 %v768_v44, %v1705_v57  ;;  %v771_v52 = vmul.f32 %v769_v45, %v1708_v58  ;;  %1285 = vmatprep.subr.bf16.mxu1 %v1284_v43 }
 0x29b   : > { %1287 = vmatpush1.bf16.msra.mxu1 %v1286_v41  ;;  %v773_v54 = vpop.permute.xlu0 %772 }
 0x29c   : > { %v1290_v55 = vpack.c.bf16 %v770_v48, %v1778_v59  ;;  %v775_v56 = vpop.permute.xlu1 %774  ;;  %v1288_v61 = vpack.c.bf16 %v771_v52, %v1780_v60  ;;  %v1056_v52 = vld [vmem:[%s2069_s9] sm:$0xff] }
 0x29d   : > { %v776_v62 = vsel %vm581_vm5, %v773_v54, %v775_v56  ;;  %v777_v63 = vsel %vm581_vm5, %v775_v56, %v773_v54 }
 0x29e   : > { %1289 = vmatprep.subr.bf16.mxu1 %v1288_v61  ;;  %v778_v59 = vmul.f32 %v776_v62, %v1726_v18  ;;  %v779_v60 = vmul.f32 %v777_v63, %v1729_v21 }
 0x29f   : > { %1291 = vmatpush1.bf16.msra.mxu1 %v1290_v55  ;;  %v781_v0 = vpop.permute.xlu0 %780 }
 0x2a0   : > { %v783_v1 = vpop.permute.xlu1 %782 }
 0x2a1   : > { %v784_v2 = vsel %vm598_vm6, %v781_v0, %v783_v1  ;;  %v785_v3 = vsel %vm598_vm6, %v783_v1, %v781_v0 }
 0x2a2   : > { %v786_v6 = vmul.f32 %v784_v2, %v1733_v17  ;;  %v787_v7 = vmul.f32 %v785_v3, %v1736_v23 }
 0x2a3   : > { %v789_v8 = vpop.permute.xlu0 %788 }
 0x2a4   : > { %v1294_v9 = vpack.c.bf16 %v786_v6, %v778_v59  ;;  %v791_v10 = vpop.permute.xlu1 %790  ;;  %v1292_v13 = vpack.c.bf16 %v787_v7, %v779_v60 }
 0x2a5   : > { %v793_v15 = vsel %vm615_vm7, %v791_v10, %v789_v8  ;;  %v792_v16 = vsel %vm615_vm7, %v789_v8, %v791_v10 }
 0x2a6   : > { %v795_v19 = vmul.f32 %v1754_v34, %v793_v15  ;;  %1293 = vmatprep.subr.bf16.mxu1 %v1292_v13  ;;  %v794_v12 = vmul.f32 %v1761_v40, %v792_v16 }
 0x2a7   : > { %1295 = vmatpush1.bf16.msra.mxu1 %v1294_v9 }
 0x2a8   : > { %820 = vmatprep.subr.mxu1 %v795_v19 }
 0x2ab   : > { %821 = vmatpush1.msra.mxu1 %v794_v12 }
 0x2ac   : > { %1251 = vmatmul.mubr.msk.f32.vlgmr.msra.gmra.mrb[4].mxu1 %vm630_vm8, %v796_v11 }
 0x2ad   : > { %874 = vmatprep.mubr.f32.mxu1 %v1449_v14 }
 0x2b0   : > { %1252 = vmatmul.mubr.msk.f32.gmra.mrb[6].mxu1 %vm630_vm8, %v797_v25 }
 0x2b4   : > { %v885_v35 = vpop.permute.xlu0 %884 }
 0x2b5   : > { %v893_v41 = vpop.permute.xlu1 %892 }
 0x37f   : > { %v870_v22 = vpop.f32.mrb[4].mxu1 }
 0x380   : > { %v1885_v24 = vadd.f32 %v870_v22, %v1772_v47  ;;  %v872_v32 = vpop.f32.mrb[5].mxu1 }
 0x381   : > { %v1888_v33 = vadd.f32 %v872_v32, %v1775_v53  ;;  %v1048_v53 = vld [vmem:[%s2068_s8] sm:$0xff] }
 0x383   : > { %v876_v36 = vpop.f32.mrb[6].mxu1 }
 0x384   : > { %v887_v37 = vmul.f32 %v885_v35, %v876_v36  ;;  %v1890_v38 = vadd.f32 %v876_v36, %v709_v26  ;;  %v878_v39 = vpop.f32.mrb[7].mxu1 }
 0x385   : > { %v888_v42 = vmul.f32 %v885_v35, %v878_v39  ;;  %v1892_v43 = vadd.f32 %v878_v39, %v711_v31 }
 0x386   : > { %v895_v44 = vadd.f32 %v893_v41, %v887_v37 }
 0x387   : > { %v896_v45 = vadd.f32 %v893_v41, %v888_v42 }
 0x388   : > { %v1894_v48 = vmax.f32 %v895_v44, 0.0 }
 0x389   : > { %v1896_v47 = vmax.f32 %v896_v45, 0.0 }
 0x38a   : > { %899 = vrot.lane.b32.xlu0 %v1894_v48, %s2102_s0 }
 0x38b   : > { %901 = vrot.lane.b32.xlu1 %v1896_v47, %s2102_s0 }
 0x38e   : > { %907 = vrot.lane.b32.xlu0 %v1894_v48, %s2103_s22 }
 0x38f   : > { %909 = vrot.lane.b32.xlu1 %v1896_v47, %s2103_s22 }
 0x392   : > { %915 = vrot.lane.b32.xlu0 %v1894_v48, %s2098_s20 }
 0x393   : > { %917 = vrot.lane.b32.xlu1 %v1896_v47, %s2098_s20 }
 0x396   : > { %923 = vrot.lane.b32.xlu0 %v1894_v48, %s2099_s15 }
 0x397   : > { %925 = vrot.lane.b32.xlu1 %v1896_v47, %s2099_s15  ;;  %s2016_s15 = scalar_lea.hbm %s2074_s14, %s1263_s27 }
 0x39a   : > { %931 = vrot.lane.b32.xlu0 %v1894_v48, %s2100_s21 }
 0x39b   : > { %933 = vrot.lane.b32.xlu1 %v1896_v47, %s2100_s21 }
 0x39e   : > { %939 = vrot.lane.b32.xlu0 %v1894_v48, %s1446_s28 }
 0x39f   : > { %941 = vrot.lane.b32.xlu1 %v1896_v47, %s1446_s28 }
 0x3a2   : > { %947 = vrot.lane.b32.xlu0 %v1894_v48, %s1447_s18 }
 0x3a3   : > { %949 = vrot.lane.b32.xlu1 %v1896_v47, %s1447_s18 }
 0x3a6   : > { %1051 = vperm.xlu0 %1374, %v1048_v53  }
 0x3a7   : > { %955 = vrot.lane.b32.xlu1 %v1894_v48, %s2101_s25 }
 0x3aa   : > { %957 = vrot.lane.b32.xlu0 %v1896_v47, %s2101_s25  ;;  %s1244_s25 = sshll.u32 %s458_s26, 5 }
 0x3ab   : > { %1059 = vperm.xlu1 %1375, %v1056_v52   ;;  %s460_s28 = scalar_lea.vmem [#allocation2], %s1244_s25  ;;  %s1450_s25 = smov [#allocation2]  }
 0x3ac   : > { %s1178_s18 = sshll.u32 %s460_s28, 4  ;;  %s1380_s1 = sshll.u32 %s1450_s25, 4  ;;  %s2009_s18 = int_to_ptr.vmem [resolvable:$true] %s1178_s18  ;;  %s1381_s1 = int_to_ptr.vmem [resolvable:$false] %s1380_s1 }
 0x3ad   : > { %s1376_s21 = scalar_lea.vmem %s2009_s18, 512  ;;  %s1382_s2 = scalar_lea.vmem %s1381_s1, 1024 }
 0x3ae   : > { %p1377_p11 = scmp.ne.s32.totalorder %s2009_s18, %s1376_s21  ;;  %p1383_p0 = scmp.lt.s32.totalorder %s2009_s18, %s1381_s1 }
 0x3af   : > { %p1384_p1 = scmp.lt.s32.totalorder %s1382_s2, %s1376_s21 }
 0x3b0   : > { %p1378_p12 = pnand %p1377_p11, %p1565_p5 }
 0x3b1   : > { %p1385_p2 = por %p1384_p1, %p1383_p0 }
 0x3b2   : > { %p1379_p13 = pneg %p1378_p12 }
 0x3b4   : > { %p1386_p3 = pnand %p1385_p2, %p1379_p13 }
 0x3fc   : > { %v900_v54 = vpop.permute.xlu0 %899 }
 0x3fd   : > { %v902_v55 = vpop.permute.xlu1 %901 }
 0x3fe   : > { %v903_v56 = vsel %vm496_vm0, %v900_v54, %v902_v55  ;;  %v904_v61 = vsel %vm496_vm0, %v902_v55, %v900_v54 }
 0x3ff   : > { %v905_v2 = vmul.f32 %v904_v61, %v1654_v27  ;;  %v906_v59 = vmul.f32 %v903_v56, %v1661_v29 }
 0x400   : > { %v908_v62 = vpop.permute.xlu0 %907 }
 0x401   : > { %v910_v63 = vpop.permute.xlu1 %909 }
 0x402   : > { %v911_v0 = vsel %vm513_vm1, %v908_v62, %v910_v63  ;;  %v912_v1 = vsel %vm513_vm1, %v910_v63, %v908_v62 }
 0x403   : > { %v913_v3 = vmul.f32 %v912_v1, %v1658_v28  ;;  %v914_v60 = vmul.f32 %v911_v0, %v1664_v30 }
 0x404   : > { %v916_v6 = vpop.permute.xlu0 %915 }
 0x405   : > { %v918_v7 = vpop.permute.xlu1 %917  ;;  %v1296_v8 = vpack.c.bf16 %v914_v60, %v906_v59  ;;  %v1298_v9 = vpack.c.bf16 %v913_v3, %v905_v2 }
 0x406   : > { %v919_v10 = vsel %vm530_vm2, %v916_v6, %v918_v7  ;;  %v920_v13 = vsel %vm530_vm2, %v918_v7, %v916_v6 }
 0x407   : > { %1297 = vmatprep.subr.bf16.mxu0 %v1296_v8  ;;  %v921_v30 = vmul.f32 %v920_v13, %v1682_v46  ;;  %v922_v16 = vmul.f32 %v919_v10, %v1686_v49 }
 0x408   : > { %1299 = vmatpush1.bf16.msra.mxu0 %v1298_v9  ;;  %v924_v15 = vpop.permute.xlu0 %923 }
 0x409   : > { %v926_v27 = vpop.permute.xlu1 %925 }
 0x40a   : > { %v927_v28 = vsel %vm547_vm3, %v924_v15, %v926_v27  ;;  %v928_v29 = vsel %vm547_vm3, %v926_v27, %v924_v15 }
 0x40b   : > { %v929_v19 = vmul.f32 %v928_v29, %v1690_v50  ;;  %v930_v12 = vmul.f32 %v927_v28, %v1693_v51 }
 0x40c   : > { %v932_v11 = vpop.permute.xlu0 %931 }
 0x40d   : > { %v934_v25 = vpop.permute.xlu1 %933  ;;  %v1300_v26 = vpack.c.bf16 %v930_v12, %v922_v16  ;;  %v1302_v31 = vpack.c.bf16 %v929_v19, %v921_v30 }
 0x40e   : > { %v935_v22 = vsel %vm564_vm4, %v932_v11, %v934_v25  ;;  %v936_v32 = vsel %vm564_vm4, %v934_v25, %v932_v11 }
 0x40f   : > { %v937_v35 = vmul.f32 %v935_v22, %v1705_v57  ;;  %v938_v46 = vmul.f32 %v936_v32, %v1708_v58  ;;  %1301 = vmatprep.subr.bf16.mxu0 %v1300_v26 }
 0x410   : > { %1303 = vmatpush1.bf16.msra.mxu0 %v1302_v31  ;;  %v940_v49 = vpop.permute.xlu0 %939 }
 0x411   : > { %v942_v50 = vpop.permute.xlu1 %941  ;;  %v1304_v51 = vpack.c.bf16 %v938_v46, %v1896_v47  ;;  %v1306_v36 = vpack.c.bf16 %v937_v35, %v1894_v48 }
 0x412   : > { %v943_v37 = vsel %vm581_vm5, %v940_v49, %v942_v50  ;;  %v944_v39 = vsel %vm581_vm5, %v942_v50, %v940_v49 }
 0x413   : > { %1305 = vmatprep.subr.bf16.mxu0 %v1304_v51  ;;  %v945_v44 = vmul.f32 %v943_v37, %v1726_v18  ;;  %v946_v45 = vmul.f32 %v944_v39, %v1729_v21 }
 0x414   : > { %1307 = vmatpush1.bf16.msra.mxu0 %v1306_v36  ;;  %v948_v41 = vpop.permute.xlu0 %947 }
 0x415   : > { %v950_v57 = vpop.permute.xlu1 %949 }
 0x416   : > { %v951_v58 = vsel %vm598_vm6, %v948_v41, %v950_v57  ;;  %v952_v42 = vsel %vm598_vm6, %v950_v57, %v948_v41 }
 0x417   : > { %v953_v48 = vmul.f32 %v951_v58, %v1733_v17  ;;  %v954_v47 = vmul.f32 %v952_v42, %v1736_v23 }
 0x419   : > { %v1308_v53 = vpack.c.bf16 %v954_v47, %v946_v45  ;;  %v1310_v52 = vpack.c.bf16 %v953_v48, %v945_v44  ;;  %v956_v55 = vpop.permute.xlu1 %955 }
 0x41b   : > { %1309 = vmatprep.subr.bf16.mxu0 %v1308_v53 }
 0x41c   : > { %1311 = vmatpush1.bf16.msra.mxu0 %v1310_v52 }
 0x425   : > { %v1052_v54 = vpop.permute.xlu0 %1051 }
 0x426   : > { %v1054_v56 = vmul.f32 %v1052_v54, %v1586_v4  ;;  %v1055_v61 = vmul.f32 %v1052_v54, %v1588_v5  ;;  %v963_v4 = vld [vmem:[%s2072_s12] sm:$0xff] }
 0x429   : > { %v958_v62 = vpop.permute.xlu0 %957 }
 0x42a   : > { %v959_v18 = vsel %vm615_vm7, %v956_v55, %v958_v62  ;;  %v960_v21 = vsel %vm615_vm7, %v958_v62, %v956_v55  ;;  %v1060_v17 = vpop.permute.xlu1 %1059 }
 0x42b   : > { %v961_v23 = vmul.f32 %v1761_v40, %v959_v18  ;;  %v962_v63 = vmul.f32 %v1754_v34, %v960_v21  ;;  %v1062_v0 = vadd.f32 %v1060_v17, %v1054_v56  ;;  %v1063_v1 = vadd.f32 %v1060_v17, %v1055_v61  ;;  %v1066_v34 = vld [vmem:[%s2073_s13] sm:$0xff]  ;;  %v1067_v40 = vld [vmem:[%s2073_s13 + $0x8] sm:$0xff] }
 0x42d   : > { %v1064_v2 = vmax.f32 %v1062_v0, 0.0  ;;  %v1065_v5 = vmax.f32 %v1063_v1, 0.0  ;;  %987 = vmatprep.subr.mxu0 %v962_v63 }
 0x42e   : > { %988 = vmatpush1.msra.mxu0 %v961_v23 }
 0x42f   : > { %1253 = vmatmul.mubr.msk.f32.vlgmr.msra.gmra.mrb[0].mxu0 %vm630_vm8, %v963_v4  ;;  %1075 = vmatprep.subr.mxu0 %v1065_v5 }
 0x430   : > { %1076 = vmatpush1.msra.mxu0 %v1064_v2  ;;  %1041 = vmatprep.mubr.f32.mxu0 %v1449_v14 }
 0x433   : > { %1254 = vmatmul.mubr.msk.f32.gmra.mrb[2].mxu0 %vm630_vm8, %v964_v20 }
 0x434   : > { %1139 = vmatprep.mubr.f32.mxu0 %v1449_v14 }
 0x437   : > { %1255 = vmatmul.mubr.msk.f32.vlgmr.msra.gmra.mrb[0].mxu0 %vm1068_vm9, %v1066_v34 }
 0x438   : > { %1145 = vmatprep.mubr.f32.mxu0 %v1449_v14 }
 0x43b   : > { %1256 = vmatmul.mubr.msk.f32.gmra.mrb[2].mxu0 %vm1068_vm9, %v1067_v40 }
 0x50a   : > { %v1141_v3 = vpop.f32.mrb[0].mxu0 }
 0x50b   : > { %v1317_v59 = vadd.f32 %v1885_v24, %v1141_v3  ;;  %v1143_v60 = vpop.f32.mrb[1].mxu0 }
 0x50c   : > { %v1319_v6 = vadd.f32 %v1888_v33, %v1143_v60 }
 0x50d   : > { %1160 = vst [vmem:[%s460_s28] sm:$0xff] %v1317_v59 }
 0x50e   : > { %1161 = vst [vmem:[%s460_s28 + $0x8] sm:$0xff] %v1319_v6  ;;  %v1147_v14 = vpop.f32.mrb[2].mxu0 }
 0x50f   : > { %v1313_v7 = vadd.f32 %v1890_v38, %v1147_v14  ;;  %v1149_v8 = vpop.f32.mrb[3].mxu0 }
 0x510   : > { %v1315_v24 = vadd.f32 %v1892_v43, %v1149_v8 }
 0x511   : > { %1162 = vst [vmem:[%s460_s28 + $0x10] sm:$0xff] %v1313_v7 }
 0x512   : > { %1163 = vst [vmem:[%s460_s28 + $0x18] sm:$0xff] %v1315_v24 }
 0x513   : > { %1389 = shalt.err (!%p1386_p3)
}
 0x514   : > { %s1390_s26 = scalar_lea.hbm %s2016_s15, 512  ;;  %s1394_s0 = scalar_lea.hbm %s2074_s14, 1024 }
 0x515   : > { %p1391_p4 = scmp.ne.s32.totalorder %s2016_s15, %s1390_s26  ;;  %p1395_p9 = scmp.lt.u32.totalorder %s2016_s15, %s2074_s14 }
 0x516   : > { %p1396_p10 = scmp.lt.u32.totalorder %s1394_s0, %s1390_s26  ;;  %p1398_p12 = scmp.lt.u32.totalorder %s1390_s26, %s2016_s15 }
 0x517   : > { %p1392_p7 = pnand %p1391_p4, %p1565_p5 }
 0x518   : > { %p1397_p11 = por %p1396_p10, %p1395_p9 }
 0x519   : > { %p1393_p8 = pneg %p1392_p7 }
 0x51a   : > { %p1399_p13 = por %p1398_p12, %p1397_p11 }
 0x51c   : > { %p1400_p0 = pnand %p1399_p13, %p1393_p8 }
 0x51e   : > { %1403 = shalt.err (!%p1400_p0)
}
 0x51f   : > { %s1451_s2 = smov 256  }
 0x520   : > { %1324 = dma.vmem_to_hbm [thread:$0]  (%p1565_p5), %s2009_s18, 512, %s2016_s15, %s2018_s17, %s1451_s2, %s1451_s2, %s2103_s22  }
 0x521 PF: > { %p1330_p1 = scmp.ge.s32.totalorder %s1438_s16, 2  ;;  %s1193_s21 = sand.u32 1, %s1426_s29  }
 0x522   : > { %s1194_s25 = scalar_lea.sflag [#allocation3], %s1193_s21 }
 0x523   : > { %p1327_p2 = pnand %p1330_p1, %p1569_p6 }
 0x525   : > { %1421 = dma.done.wait (!%p1327_p2), %s1194_s25, 512  }
 0x526   : > { %1423 = vsyncadd (!%p1327_p2), %s1194_s25, 4294966784  ;;  %s2104_s26 = sld [smem:[#allocation5_spill]]  ;;  %s2105_s15 = sld [smem:[#allocation6_spill]] }
 0x527   : > { %p24_p3 = scmp.ge.s32.totalorder %s1552_s19, 4   ;;  %s2106_s29 = smov %s1430_s30 }
 0x528   : > { %s2108_s16 = smov %s1552_s19 }
 0x529   :  { %26 = sbr.rel (!%p24_p3) target bundleno = 7 (0x7), region = 111 }
 0x52c   : > { %s2107_s30 = smov %s2104_s26 }
 0x530   :  { %1199 = vsyncpa [#allocation3], 1 }
 0x531   :  { %1201 = vsyncpa [#allocation3 + $0x1], 1 }

</bundles_post_ra>
